<compile_context>
chip_gen: v7x
topology: tpu7x:2x2x1
jax: 0.10.0
libtpu: 0.0.40
codegen_flags: <defaults>
</compile_context>

<pallas_src>
import functools

import jax
import jax.numpy as jnp
from jax.experimental import pallas as pl
from jax.experimental.pallas import tpu as pltpu


def _round_up(n, m):
    return ((n + m - 1) // m) * m


def bpnn_kernel(num_hidden, *refs):
    """Fused MLP forward for one batch tile.

    refs layout:
      refs[0]            : x_ref   (tile_b, in_p)   f32
      per layer          : w (K_p, N_p) bf16 , b (1, N_p) f32
                           (num_hidden hidden layers, then the output layer)
      refs[-1]           : out_ref (tile_b, out_p)  f32

    BatchNorm1d (eval mode) and the Linear bias are pre-folded into (w, b) by
    the wrapper; Dropout is identity at inference.
    """
    x_ref = refs[0]
    out_ref = refs[-1]

    h = x_ref[...]                                   # f32 activations
    idx = 1
    for _ in range(num_hidden):
        w_ref, b_ref = refs[idx], refs[idx + 1]
        idx += 2
        z = jnp.dot(h.astype(jnp.bfloat16), w_ref[...],
                    preferred_element_type=jnp.float32) + b_ref[...]
        h = jnp.maximum(z, 0.0)                      # ReLU (epilogue in f32)

    w_ref, b_ref = refs[idx], refs[idx + 1]
    out_ref[...] = jnp.dot(h.astype(jnp.bfloat16), w_ref[...],
                           preferred_element_type=jnp.float32) + b_ref[...]


def prepare_params(raw, input_size, output_size, eps=1e-5):
    """Fold BN into the Linear, transpose to (in, out), zero-pad every feature
    dim to a multiple of 128 (lane-dense), and cast weights to bf16."""
    hidden, (w_out_pt, b_out) = raw
    layers = []
    in_dim = input_size
    in_p = _round_up(input_size, 128)
    first_in_p = in_p
    for hp in hidden:
        w_pt, b = hp["w"], hp["b"]                   # w_pt: (out, in)
        gamma, beta, mean, var = hp["gamma"], hp["beta"], hp["mean"], hp["var"]
        out_dim = w_pt.shape[0]
        out_p = _round_up(out_dim, 128)
        s = gamma / jnp.sqrt(var + eps)              # (out,)
        w_f = w_pt.T * s[None, :]                    # (in, out), BN folded
        b_f = (b - mean) * s + beta
        w_pad = jnp.zeros((in_p, out_p), jnp.float32).at[:in_dim, :out_dim].set(w_f)
        b_pad = jnp.zeros((1, out_p), jnp.float32).at[0, :out_dim].set(b_f)
        layers.append((w_pad.astype(jnp.bfloat16), b_pad))
        in_dim, in_p = out_dim, out_p

    out_dim = w_out_pt.shape[0]
    out_p = _round_up(out_dim, 128)
    w_pad = jnp.zeros((in_p, out_p), jnp.float32).at[:in_dim, :out_dim].set(w_out_pt.T)
    b_pad = jnp.zeros((1, out_p), jnp.float32).at[0, :out_dim].set(b_out)
    layers.append((w_pad.astype(jnp.bfloat16), b_pad))

    return dict(layers=layers, in_padded=first_in_p, out_padded=out_p,
                output_size=out_dim)


def bpnn_forward(x, prepared, *, tile_b=128):
    layers = prepared["layers"]
    in_p = prepared["in_padded"]
    out_p = prepared["out_padded"]
    output_size = prepared["output_size"]
    num_hidden = len(layers) - 1

    B, F = x.shape
    x = x.astype(jnp.float32)
    if F < in_p:                                     # lane-dense feature padding
        x = jnp.pad(x, ((0, 0), (0, in_p - F)))

    # Batch tile: multiple of 8 (f32 sublane); several grid steps for larger B
    # so DMAs pipeline behind compute and v7x can split the batch across cores.
    tile_b = max(8, min(_round_up(tile_b, 8), _round_up(B, 8)))
    B_p = _round_up(B, tile_b)
    if B_p != B:
        x = jnp.pad(x, ((0, B_p - B), (0, 0)))
    grid = (B_p // tile_b,)

    inputs = [x]
    in_specs = [pl.BlockSpec((tile_b, in_p), lambda i: (i, 0))]
    for w, b in layers:
        inputs += [w, b]
        in_specs += [pl.BlockSpec(w.shape, lambda i: (0, 0)),
                     pl.BlockSpec(b.shape, lambda i: (0, 0))]
    out_spec = pl.BlockSpec((tile_b, out_p), lambda i: (i, 0))

    # Explicit VMEM budget: double-buffered x/out tiles + (possibly
    # double-buffered) resident weights/biases + headroom.
    act_bytes = 4 * tile_b * (in_p + out_p)
    param_bytes = sum(int(a.size) * a.dtype.itemsize for pair in layers for a in pair)
    vmem_limit = int(min(max(2 * act_bytes + 2 * param_bytes + (8 << 20), 16 << 20),
                         96 << 20))

    kernel = functools.partial(bpnn_kernel, num_hidden)
    out = pl.pallas_call(
        kernel,
        out_shape=jax.ShapeDtypeStruct((B_p, out_p), jnp.float32),
        grid_spec=pltpu.PrefetchScalarGridSpec(
            num_scalar_prefetch=0,
            grid=grid,
            in_specs=in_specs,
            out_specs=out_spec,
        ),
        compiler_params=pltpu.CompilerParams(
            dimension_semantics=("parallel",),
            vmem_limit_bytes=vmem_limit,
        ),
    )(*inputs)
    return out[:B, :output_size]


def init_raw_params(key, input_size, hidden_sizes, output_size):
    """Deterministic synthetic parameters in PyTorch layout (W: (out, in))."""
    hidden = []
    in_dim = input_size
    for h in hidden_sizes:
        key, kw, kb, kg, kbt, km, kv = jax.random.split(key, 7)
        hidden.append(dict(
            w=jax.random.normal(kw, (h, in_dim), jnp.float32) * 0.1,
            b=jax.random.normal(kb, (h,), jnp.float32) * 0.1,
            gamma=1.0 + 0.1 * jax.random.normal(kg, (h,), jnp.float32),
            beta=0.1 * jax.random.normal(kbt, (h,), jnp.float32),
            mean=0.1 * jax.random.normal(km, (h,), jnp.float32),
            var=0.5 + jnp.abs(jax.random.normal(kv, (h,), jnp.float32)),
        ))
        in_dim = h
    key, kw, kb = jax.random.split(key, 3)
    w_out = jax.random.normal(kw, (output_size, in_dim), jnp.float32) * 0.1
    b_out = jax.random.normal(kb, (output_size,), jnp.float32) * 0.1
    return hidden, (w_out, b_out)


def reference_forward_f32(x, raw, eps=1e-5):
    """Original module math (Linear -> BN(eval) -> ReLU -> [Dropout=id]) in f32."""
    hidden, (w_out_pt, b_out) = raw
    h = x
    for hp in hidden:
        z = h @ hp["w"].T + hp["b"]
        z = (z - hp["mean"]) / jnp.sqrt(hp["var"] + eps) * hp["gamma"] + hp["beta"]
        h = jnp.maximum(z, 0.0)
    return h @ w_out_pt.T + b_out


def reference_forward_folded(x, prepared):
    """Matched-precision reference (same bf16 weights / cast points as kernel)."""
    layers = prepared["layers"]
    in_p = prepared["in_padded"]
    B, F = x.shape
    h = jnp.pad(x.astype(jnp.float32), ((0, 0), (0, in_p - F)))
    for w, b in layers[:-1]:
        z = jnp.dot(h.astype(jnp.bfloat16), w, preferred_element_type=jnp.float32) + b
        h = jnp.maximum(z, 0.0)
    w, b = layers[-1]
    o = jnp.dot(h.astype(jnp.bfloat16), w, preferred_element_type=jnp.float32) + b
    return o[:, :prepared["output_size"]]


if __name__ == "__main__":
    # TODO(synk): training-mode Dropout / batch-statistics BatchNorm not modeled
    # (inference semantics only, matching model.eval()).
    input_size = 16
    hidden_sizes = [64, 64]
    output_size = 1
    batch = 256          # small, but gives a 2-step "parallel" batch grid (tile_b=128)

    key = jax.random.PRNGKey(0)
    key, kx = jax.random.split(key)
    x = jax.random.normal(kx, (batch, input_size), jnp.float32)

    raw = init_raw_params(key, input_size, hidden_sizes, output_size)
    prepared = prepare_params(raw, input_size, output_size)

    out = bpnn_forward(x, prepared, tile_b=128)
    out = jax.block_until_ready(out)
    assert out.shape == (batch, output_size)

    # Tight check vs a matched-precision (bf16 weights, f32 accumulate) reference.
    ref_folded = reference_forward_folded(x, prepared)
    assert jnp.allclose(out, ref_folded, atol=2e-3, rtol=2e-3), (
        f"mismatch vs folded ref: max abs err {jnp.max(jnp.abs(out - ref_folded))}")

    # Looser sanity check vs the original full-f32 Linear->BN->ReLU math.
    ref_f32 = reference_forward_f32(x, raw)
    assert jnp.allclose(out, ref_f32, atol=5e-2, rtol=5e-2), (
        f"mismatch vs f32 ref: max abs err {jnp.max(jnp.abs(out - ref_f32))}")

    print("KERNEL_OK")
</pallas_src>

<mosaic_0001>
module attributes {stable_mosaic.version = 11 : i64} {
  func.func @bpnn_kernel(%arg0: i32, %arg1: memref<128x128xf32, #tpu.memory_space<vmem>>, %arg2: memref<128x128xbf16, #tpu.memory_space<vmem>>, %arg3: memref<1x128xf32, #tpu.memory_space<vmem>>, %arg4: memref<128x128xbf16, #tpu.memory_space<vmem>>, %arg5: memref<1x128xf32, #tpu.memory_space<vmem>>, %arg6: memref<128x128xbf16, #tpu.memory_space<vmem>>, %arg7: memref<1x128xf32, #tpu.memory_space<vmem>>, %arg8: memref<128x128xf32, #tpu.memory_space<vmem>>) attributes {dimension_semantics = [#tpu.dimension_semantics<parallel>], iteration_bounds = array<i64: 2>, scalar_prefetch = 0 : i64, scratch_operands = 0 : i64, tpu.core_type = #tpu.core_type<tc>, window_params = [{transform_indices = @transform_0, window_bounds = array<i64: 128, 128>}, {pipeline_mode = #tpu.pipeline_mode<synchronous>, transform_indices = @transform_1, window_bounds = array<i64: 128, 128>}, {pipeline_mode = #tpu.pipeline_mode<synchronous>, transform_indices = @transform_2, window_bounds = array<i64: 1, 128>}, {pipeline_mode = #tpu.pipeline_mode<synchronous>, transform_indices = @transform_3, window_bounds = array<i64: 128, 128>}, {pipeline_mode = #tpu.pipeline_mode<synchronous>, transform_indices = @transform_4, window_bounds = array<i64: 1, 128>}, {pipeline_mode = #tpu.pipeline_mode<synchronous>, transform_indices = @transform_5, window_bounds = array<i64: 128, 128>}, {pipeline_mode = #tpu.pipeline_mode<synchronous>, transform_indices = @transform_6, window_bounds = array<i64: 1, 128>}, {transform_indices = @transform_7, window_bounds = array<i64: 128, 128>}]} {
    %c0 = arith.constant 0 : index
    %c0_0 = arith.constant 0 : index
    %0 = vector.load %arg1[%c0, %c0_0] : memref<128x128xf32, #tpu.memory_space<vmem>>, vector<128x128xf32>
    %1 = arith.truncf %0 : vector<128x128xf32> to vector<128x128xbf16>
    %c0_1 = arith.constant 0 : index
    %c0_2 = arith.constant 0 : index
    %2 = vector.load %arg2[%c0_1, %c0_2] : memref<128x128xbf16, #tpu.memory_space<vmem>>, vector<128x128xbf16>
    %cst = arith.constant dense<0.000000e+00> : vector<128x128xf32>
    %3 = tpu.matmul %1, %2, %cst {dimension_numbers = #tpu.dot_dimension_numbers<[1], [0], [0], [1], [0, 0, 1, 1], [], []>} : vector<128x128xbf16>, vector<128x128xbf16>, vector<128x128xf32> -> vector<128x128xf32>
    %c0_3 = arith.constant 0 : index
    %c0_4 = arith.constant 0 : index
    %4 = vector.load %arg3[%c0_3, %c0_4] : memref<1x128xf32, #tpu.memory_space<vmem>>, vector<1x128xf32>
    %5 = vector.broadcast %4 : vector<1x128xf32> to vector<128x128xf32>
    %6 = arith.addf %3, %5 : vector<128x128xf32>
    %cst_5 = arith.constant 0.000000e+00 : f32
    %7 = vector.broadcast %cst_5 : f32 to vector<128x128xf32>
    %8 = arith.maximumf %6, %7 : vector<128x128xf32>
    %9 = arith.truncf %8 : vector<128x128xf32> to vector<128x128xbf16>
    %c0_6 = arith.constant 0 : index
    %c0_7 = arith.constant 0 : index
    %10 = vector.load %arg4[%c0_6, %c0_7] : memref<128x128xbf16, #tpu.memory_space<vmem>>, vector<128x128xbf16>
    %cst_8 = arith.constant dense<0.000000e+00> : vector<128x128xf32>
    %11 = tpu.matmul %9, %10, %cst_8 {dimension_numbers = #tpu.dot_dimension_numbers<[1], [0], [0], [1], [0, 0, 1, 1], [], []>} : vector<128x128xbf16>, vector<128x128xbf16>, vector<128x128xf32> -> vector<128x128xf32>
    %c0_9 = arith.constant 0 : index
    %c0_10 = arith.constant 0 : index
    %12 = vector.load %arg5[%c0_9, %c0_10] : memref<1x128xf32, #tpu.memory_space<vmem>>, vector<1x128xf32>
    %13 = vector.broadcast %12 : vector<1x128xf32> to vector<128x128xf32>
    %14 = arith.addf %11, %13 : vector<128x128xf32>
    %cst_11 = arith.constant 0.000000e+00 : f32
    %15 = vector.broadcast %cst_11 : f32 to vector<128x128xf32>
    %16 = arith.maximumf %14, %15 : vector<128x128xf32>
    %17 = arith.truncf %16 : vector<128x128xf32> to vector<128x128xbf16>
    %c0_12 = arith.constant 0 : index
    %c0_13 = arith.constant 0 : index
    %18 = vector.load %arg6[%c0_12, %c0_13] : memref<128x128xbf16, #tpu.memory_space<vmem>>, vector<128x128xbf16>
    %cst_14 = arith.constant dense<0.000000e+00> : vector<128x128xf32>
    %19 = tpu.matmul %17, %18, %cst_14 {dimension_numbers = #tpu.dot_dimension_numbers<[1], [0], [0], [1], [0, 0, 1, 1], [], []>} : vector<128x128xbf16>, vector<128x128xbf16>, vector<128x128xf32> -> vector<128x128xf32>
    %c0_15 = arith.constant 0 : index
    %c0_16 = arith.constant 0 : index
    %20 = vector.load %arg7[%c0_15, %c0_16] : memref<1x128xf32, #tpu.memory_space<vmem>>, vector<1x128xf32>
    %21 = vector.broadcast %20 : vector<1x128xf32> to vector<128x128xf32>
    %22 = arith.addf %19, %21 : vector<128x128xf32>
    %c0_17 = arith.constant 0 : index
    %c0_18 = arith.constant 0 : index
    %23 = vector.load %arg8[%c0_17, %c0_18] : memref<128x128xf32, #tpu.memory_space<vmem>>, vector<128x128xf32>
    tpu.vector_store %arg8[%c0_17, %c0_18], %22 {strides = array<i32>} : memref<128x128xf32, #tpu.memory_space<vmem>>, vector<128x128xf32>,
    return
  }
  func.func @transform_0(%arg0: i32) -> (i32, i32) {
    %c0_i32 = arith.constant 0 : i32
    %c0_i32_0 = arith.constant 0 : i32
    return %arg0, %c0_i32 : i32, i32
  }
  func.func @transform_1(%arg0: i32) -> (i32, i32) {
    %c0_i32 = arith.constant 0 : i32
    %c0_i32_0 = arith.constant 0 : i32
    %c0_i32_1 = arith.constant 0 : i32
    return %c0_i32, %c0_i32_0 : i32, i32
  }
  func.func @transform_2(%arg0: i32) -> (i32, i32) {
    %c0_i32 = arith.constant 0 : i32
    %c0_i32_0 = arith.constant 0 : i32
    %c0_i32_1 = arith.constant 0 : i32
    return %c0_i32, %c0_i32_0 : i32, i32
  }
  func.func @transform_3(%arg0: i32) -> (i32, i32) {
    %c0_i32 = arith.constant 0 : i32
    %c0_i32_0 = arith.constant 0 : i32
    %c0_i32_1 = arith.constant 0 : i32
    return %c0_i32, %c0_i32_0 : i32, i32
  }
  func.func @transform_4(%arg0: i32) -> (i32, i32) {
    %c0_i32 = arith.constant 0 : i32
    %c0_i32_0 = arith.constant 0 : i32
    %c0_i32_1 = arith.constant 0 : i32
    return %c0_i32, %c0_i32_0 : i32, i32
  }
  func.func @transform_5(%arg0: i32) -> (i32, i32) {
    %c0_i32 = arith.constant 0 : i32
    %c0_i32_0 = arith.constant 0 : i32
    %c0_i32_1 = arith.constant 0 : i32
    return %c0_i32, %c0_i32_0 : i32, i32
  }
  func.func @transform_6(%arg0: i32) -> (i32, i32) {
    %c0_i32 = arith.constant 0 : i32
    %c0_i32_0 = arith.constant 0 : i32
    %c0_i32_1 = arith.constant 0 : i32
    return %c0_i32, %c0_i32_0 : i32, i32
  }
  func.func @transform_7(%arg0: i32) -> (i32, i32) {
    %c0_i32 = arith.constant 0 : i32
    %c0_i32_0 = arith.constant 0 : i32
    return %arg0, %c0_i32 : i32, i32
  }
}

</mosaic_0001>

<bundles_post_ra>
// kernel: tpu_custom_call.1
= control target key start
LH: loop header
LB: loop body
LE: loop exit
PB: predicated region body
PF: predicated region fallthrough
CT: control target
= control target key end

     0   :  { %12 = vsyncpa [#allocation3], 0  ;;  %s1963_s0 = inlined_call_operand.hbm [shape: f32[256,128], index: 0, kind: input, shape index: {}]   ;;  %s1964_s1 = inlined_call_operand.hbm [shape: bf16[128,128], index: 1, kind: input, shape index: {}]   ;;  %s1965_s2 = inlined_call_operand.vmem [shape: f32[1,128], index: 2, kind: input, shape index: {}]   ;;  %s1966_s3 = inlined_call_operand.hbm [shape: bf16[128,128], index: 3, kind: input, shape index: {}]   ;;  %s1967_s4 = inlined_call_operand.vmem [shape: f32[1,128], index: 4, kind: input, shape index: {}]   ;;  %s1968_s5 = inlined_call_operand.hbm [shape: bf16[128,128], index: 5, kind: input, shape index: {}]   ;;  %s1969_s6 = inlined_call_operand.vmem [shape: f32[1,128], index: 6, kind: input, shape index: {}]   ;;  %s1970_s7 = inlined_call_operand.hbm [shape: f32[256,128], index: 7, kind: output, shape index: {}]  }
   0x1   :  { %14 = vsyncpa [#allocation3 + $0x1], 0 }
   0x2   :  { %15 = vsyncpa [#allocation6], 0 }
   0x3   :  { %16 = vsyncpa [#allocation9], 0 }
   0x4   :  { %17 = vsyncpa [#allocation4], 0 }
   0x5   :  { %19 = vsyncpa [#allocation4 + $0x1], 0  ;;  %s1609_s24 = smov 0   ;;  %s1611_s25 = smov 0  }
   0x6   :  { %s1613_s26 = smov 0   ;;  %s1615_s27 = smov 0  }
   0x7 LB: > { %s1630_s28 = sadd.s32 4294967295, %s1556_s27   ;;  %s1052_s29 = sadd.s32 4294967294, %s1556_s27   ;;  %s1556_s27 = sphi %s1615_s27, %s1996_s27   ;;  %s1552_s26 = sphi %s1613_s26, %s1995_s26   ;;  %s1548_s25 = sphi %s1611_s25, %s1994_s25   ;;  %s1544_s24 = sphi %s1609_s24, %s1993_s24  }
   0x8   : > { %p45_p0 = scmp.ne.s32.totalorder %s1548_s25, %s1544_s24  ;;  %p1971_p1 = scmp.eq.s32.totalorder %s1630_s28, 0 }
   0x9   : > { %p201_p3 = scmp.eq.s32.totalorder %s1052_s29, 1  ;;  %p1053_p5 = scmp.ge.s32.totalorder %s1556_s27, 1 }
   0xa   : > { %p1639_p4 = por %p1971_p1, %p45_p0  ;;  %p208_p7 = scmp.lt.s32.totalorder %s1556_s27, 3 }
   0xb   : > { %p1644_p6 = por %p201_p3, %p45_p0  ;;  %s1558_s10 = smov [#allocation5]  }
   0xc   : > { %s1975_s30 = scalar_select %p1639_p4, 1, 0 }
   0xd   : > { %s1976_s8 = scalar_select %p1644_p6, 1, 0 }
   0xe   : > { %p1649_p8 = pnand %p1053_p5, %p208_p7  ;;  %s220_s11 = sshll.u32 %s1558_s10, 4  ;;  %s1653_s11 = int_to_ptr.vmem [resolvable:$true] %s220_s11 }
   0xf   : > { %1977 = sst [smem:[#allocation15_spill]] %s1976_s8  ;;  %s1559_s13 = smov [#allocation7]  }
  0x10   : > { %s1978_s9 = scalar_select %p1649_p8, 1, 0 }
  0x11   : > { %p1277_p9 = pneg %p1649_p8  ;;  %s236_s14 = sshll.u32 %s1559_s13, 4  ;;  %s1664_s14 = int_to_ptr.vmem [resolvable:$true] %s236_s14 }
  0x12   : > { %s1560_s15 = smov [#allocation8]   ;;  %s1368_s19 = scalar_lea.hbm %s1964_s1, 1024 }
  0x13   : > { %p1660_p11 = pnand %p1277_p9, %p1971_p1  ;;  %s1666_s16 = sshll.u32 %s1560_s15, 4  ;;  %s253_s16 = int_to_ptr.vmem [resolvable:$true] %s1666_s16 }
  0x14   : > { %p1369_p12 = scmp.ne.s32.totalorder %s1964_s1, %s1368_s19  ;;  %p1375_p5 = scmp.lt.u32.totalorder %s1368_s19, %s1964_s1 }
  0x15   : > { %p1676_p13 = pneg %p1660_p11 }
  0x17   : > { %p1371_p0 = pnand %p1676_p13, %p1369_p12 }
  0x19   : > { %p1372_p3 = pneg %p1371_p0 }
  0x1b   : > { %p1377_p7 = pnand %p1375_p5, %p1372_p3 }
  0x1d   : > { %1380 = shalt.err (!%p1377_p7)
}
  0x1e   : > { %s1381_s10 = scalar_lea.vmem %s1653_s11, 1024  ;;  %p1389_p2 = scmp.lt.s32.totalorder %s1653_s11, %s1653_s11 }
  0x1f   : > { %p1382_p9 = scmp.ne.s32.totalorder %s1653_s11, %s1381_s10  ;;  %p1390_p6 = scmp.lt.s32.totalorder %s1381_s10, %s1381_s10 }
  0x21   : > { %p1384_p10 = pnand %p1382_p9, %p1676_p13  ;;  %p1391_p12 = por %p1390_p6, %p1389_p2 }
  0x23   : > { %p1385_p1 = pneg %p1384_p10 }
  0x25   : > { %p1392_p0 = pnand %p1391_p12, %p1385_p1 }
  0x27   : > { %1395 = shalt.err (!%p1392_p0)
}
  0x28   : > { %s1561_s13 = smov 64   ;;  %s1562_s15 = smov 4  }
  0x29   : > { %1280 = dma.hbm_to_vmem [thread:$0]  (!%p1660_p11), %s1964_s1, 1024, %s1653_s11, [#allocation6], %s1561_s13, %s1561_s13, %s1562_s15  }
  0x2a   : > { %s1396_s21 = scalar_lea.hbm %s1966_s3, 1024 }
  0x2b   : > { %p1397_p1 = scmp.ne.s32.totalorder %s1966_s3, %s1396_s21  ;;  %p1403_p10 = scmp.lt.u32.totalorder %s1396_s21, %s1966_s3 }
  0x2d   : > { %p1399_p2 = pnand %p1397_p1, %p1676_p13 }
  0x2f   : > { %p1400_p6 = pneg %p1399_p2 }
  0x31   : > { %p1405_p3 = pnand %p1403_p10, %p1400_p6 }
  0x33   : > { %1408 = shalt.err (!%p1405_p3)
}
  0x34   : > { %s1409_s11 = scalar_lea.vmem %s1664_s14, 1024  ;;  %p1417_p12 = scmp.lt.s32.totalorder %s1664_s14, %s1664_s14 }
  0x35   : > { %p1410_p5 = scmp.ne.s32.totalorder %s1664_s14, %s1409_s11  ;;  %p1418_p0 = scmp.lt.s32.totalorder %s1409_s11, %s1409_s11 }
  0x37   : > { %p1412_p7 = pnand %p1410_p5, %p1676_p13  ;;  %p1419_p1 = por %p1418_p0, %p1417_p12 }
  0x39   : > { %p1413_p9 = pneg %p1412_p7 }
  0x3b   : > { %p1420_p2 = pnand %p1419_p1, %p1413_p9 }
  0x3d   : > { %1423 = shalt.err (!%p1420_p2)
}
  0x3e   : > { %1283 = dma.hbm_to_vmem [thread:$0]  (!%p1660_p11), %s1966_s3, 1024, %s1664_s14, [#allocation6], %s1561_s13, %s1561_s13, %s1562_s15  }
  0x3f   : > { %s1424_s20 = scalar_lea.hbm %s1968_s5, 1024 }
  0x40   : > { %p1425_p6 = scmp.ne.s32.totalorder %s1968_s5, %s1424_s20  ;;  %p1431_p5 = scmp.lt.u32.totalorder %s1424_s20, %s1968_s5 }
  0x42   : > { %p1427_p10 = pnand %p1425_p6, %p1676_p13 }
  0x44   : > { %p1428_p3 = pneg %p1427_p10 }
  0x46   : > { %p1433_p7 = pnand %p1431_p5, %p1428_p3 }
  0x48   : > { %1436 = shalt.err (!%p1433_p7)
}
  0x49   : > { %s1437_s11 = scalar_lea.vmem %s253_s16, 1024  ;;  %p1445_p1 = scmp.lt.s32.totalorder %s253_s16, %s253_s16 }
  0x4a   : > { %p1438_p9 = scmp.ne.s32.totalorder %s253_s16, %s1437_s11  ;;  %p1446_p2 = scmp.lt.s32.totalorder %s1437_s11, %s1437_s11 }
  0x4c   : > { %p1440_p12 = pnand %p1438_p9, %p1676_p13  ;;  %p1447_p4 = por %p1446_p2, %p1445_p1 }
  0x4e   : > { %p1441_p0 = pneg %p1440_p12 }
  0x50   : > { %p1448_p8 = pnand %p1447_p4, %p1441_p0 }
  0x52   : > { %1451 = shalt.err (!%p1448_p8)
}
  0x53   : > { %1286 = dma.hbm_to_vmem [thread:$0]  (!%p1660_p11), %s1968_s5, 1024, %s253_s16, [#allocation9], %s1561_s13, %s1561_s13, %s1562_s15  }
  0x54   : > { %s1749_s22 = sadd.s32 1, %s1556_s27   ;;  %s32_s17 = sadd.s32 1, %s1552_s26 }
  0x55   : > { %s29_s12 = ssub.s32 %s1556_s27, %s1749_s22  ;;  %p39_p8 = scmp.ne.s32.totalorder %s1552_s26, %s1548_s25 }
  0x56   : > { %p30_p4 = scmp.eq.s32.totalorder %s29_s12, 0  ;;  %p40_p13 = scmp.eq.s32.totalorder %s1556_s27, 0 }
  0x57   : > { %p1298_p6 = scmp.lt.s32.totalorder %s1556_s27, 2  ;;  %p1981_p3 = scmp.eq.s32.totalorder %s1630_s28, 1 }
  0x58   : > { %s1759_s18 = scalar_select %p30_p4, %s1552_s26, %s32_s17  }
  0x59   : > { %p41_p10 = por %p40_p13, %p39_p8  ;;  %p1763_p5 = por %p1981_p3, %p39_p8 }
  0x5a   : > { %s269_s20 = sand.u32 1, %s1552_s26   ;;  %s1099_s21 = sshll.u32 %s1556_s27, 11 }
  0x5b   : > { %s1058_s16 = sshll.u32 %s269_s20, 7  ;;  %s1772_s23 = scalar_lea.hbm %s1963_s0, %s1099_s21 }
  0x5c   : > { %s273_s29 = scalar_lea.vmem [#allocation2], %s1058_s16  ;;  %p1774_p11 = pnand %p1298_p6, %p41_p10 }
  0x5d   : > { %s280_s10 = sshll.u32 %s273_s29, 4  ;;  %s1780_s14 = scalar_lea.sflag [#allocation3], %s269_s20  ;;  %s1778_s10 = int_to_ptr.vmem [resolvable:$true] %s280_s10 }
  0x5e   : > { %s1452_s8 = scalar_lea.hbm %s1772_s23, 2048  ;;  %p1454_p9 = pneg %p1774_p11 }
  0x5f   : > { %p1453_p7 = scmp.ne.s32.totalorder %s1772_s23, %s1452_s8  ;;  %s1457_s21 = scalar_lea.hbm %s1963_s0, 4096 }
  0x60   : > { %p1458_p1 = scmp.lt.u32.totalorder %s1772_s23, %s1963_s0  ;;  %p1459_p2 = scmp.lt.u32.totalorder %s1457_s21, %s1452_s8 }
  0x61   : > { %p1455_p12 = pnand %p1454_p9, %p1453_p7  ;;  %p1461_p8 = scmp.lt.u32.totalorder %s1452_s8, %s1772_s23 }
  0x62   : > { %p1460_p4 = por %p1459_p2, %p1458_p1 }
  0x63   : > { %p1456_p0 = pneg %p1455_p12 }
  0x64   : > { %p1462_p13 = por %p1461_p8, %p1460_p4 }
  0x66   : > { %p1463_p6 = pnand %p1462_p13, %p1456_p0 }
  0x68   : > { %1466 = shalt.err (!%p1463_p6)
}
  0x69   : > { %s1467_s20 = scalar_lea.vmem %s1778_s10, 2048  ;;  %s1563_s15 = smov [#allocation2]  }
  0x6a   : > { %p1468_p10 = scmp.ne.s32.totalorder %s1778_s10, %s1467_s20  ;;  %s1472_s29 = sshll.u32 %s1563_s15, 4  ;;  %s1473_s29 = int_to_ptr.vmem [resolvable:$false] %s1472_s29 }
  0x6b   : > { %s1474_s12 = scalar_lea.vmem %s1473_s29, 4096  ;;  %p1475_p12 = scmp.lt.s32.totalorder %s1778_s10, %s1473_s29 }
  0x6c   : > { %p1470_p3 = pnand %p1468_p10, %p1454_p9  ;;  %p1476_p1 = scmp.lt.s32.totalorder %s1474_s12, %s1467_s20 }
  0x6e   : > { %p1471_p7 = pneg %p1470_p3  ;;  %p1477_p2 = por %p1476_p1, %p1475_p12 }
  0x70   : > { %p1478_p4 = pnand %p1477_p2, %p1471_p7 }
  0x72   : > { %1481 = shalt.err (!%p1478_p4)
}
  0x73   : > { %s1564_s8 = smov 128   ;;  %s1565_s17 = smov 8  }
  0x74   : > { %1290 = dma.hbm_to_vmem [thread:$0]  (!%p1774_p11), %s1772_s23, 2048, %s1778_s10, %s1780_s14, %s1564_s8, %s1564_s8, %s1565_s17  }
  0x75   : > { %p1984_p9 = scmp.ne.s32.totalorder %s1978_s9, 0 }
  0x76   : > { %s1811_s21 = sand.u32 (!%p1984_p9), 1, %s1548_s25   ;;  %p1985_p0 = scmp.ne.s32.totalorder (!%p1984_p9), %s1975_s30, 0 }
  0x77   : > { %292 = sbr.rel (%p1984_p9) target bundleno = 867 (0x363), region = 48  ;;  %s1062_s16 = sshll.u32 (!%p1984_p9), %s1811_s21, 7 }
  0x78   : > { %s295_s13 = scalar_lea.sflag (!%p1984_p9), [#allocation3], %s1811_s21  ;;  %s1817_s20 = scalar_lea.vmem (!%p1984_p9), [#allocation2], %s1062_s16 }
  0x7e   : > { %1527 = dma.done.wait (%p1985_p0), %s295_s13, 2048  }
  0x7f   : > { %1529 = vsyncadd (%p1985_p0), %s295_s13, 4294965248  ;;  %p1986_p11 = scmp.eq.s32.totalorder %s1630_s28, 0 }
  0x81   : > { %1531 = dma.done.wait (%p1986_p11), [#allocation6], 2048   ;;  %p1987_p8 = pmov %p1986_p11 }
  0x83   : > { %1533 = vsyncadd (%p1987_p8), [#allocation6], 4294965248  ;;  %p1988_p13 = pmov %p1987_p8 }
  0x84   : > { %p1989_p6 = pmov %p1987_p8 }
  0x85   : > { %1535 = dma.done.wait (%p1988_p13), [#allocation9], 1024  }
  0x86   : > { %1537 = vsyncadd (%p1989_p6), [#allocation9], 4294966272  ;;  %v1344_v0 = vld [vmem:[#allocation5] sm:$0xff]   ;;  %v1345_v1 = vld [vmem:[#allocation5 + $0x8] sm:$0xff]   ;;  %s1894_s15 = scalar_lea.vmem [#allocation10], %s1062_s16  ;;  %s1100_s29 = sshll.u32 %s1630_s28, 11 }
  0x87   : > { %1149 = vmatprep.subr.bf16.mxu0 %v1344_v0  ;;  %v1346_v2 = vld [vmem:[#allocation5 + $0x10] sm:$0xff]   ;;  %v1347_v3 = vld [vmem:[#allocation5 + $0x18] sm:$0xff]   ;;  %v344_v4 = vld [vmem:[%s1817_s20] sm:$0xff]  ;;  %s950_s12 = sshll.u32 %s1894_s15, 4  ;;  %s1914_s16 = scalar_lea.hbm %s1970_s7, %s1100_s29  ;;  %s1916_s12 = int_to_ptr.vmem [resolvable:$true] %s950_s12 }
  0x88   : > { %1150 = vmatpush3.bf16.msra.mxu0 %v1344_v0  ;;  %v345_v5 = vld [vmem:[%s1817_s20 + $0x8] sm:$0xff]  ;;  %v1348_v7 = vld [vmem:[#allocation5 + $0x20] sm:$0xff]   ;;  %v1354_v11 = vld [vmem:[#allocation7 + $0x10] sm:$0xff]   ;;  %s937_s28 = scalar_lea.sflag [#allocation4], %s1811_s21  ;;  %s1482_s13 = scalar_lea.vmem %s1916_s12, 2048 }
  0x89   : > { %1151 = vmatprep.subr.bf16.mxu0 %v1345_v1  ;;  %v360_v6 = vpack.c.bf16 %v345_v5, %v344_v4  ;;  %v1352_v8 = vld [vmem:[#allocation7] sm:$0xff]   ;;  %v1353_v9 = vld [vmem:[#allocation7 + $0x8] sm:$0xff]   ;;  %v1350_v12 = vld [vmem:[#allocation5 + $0x30] sm:$0xff]   ;;  %p1483_p10 = scmp.ne.s32.totalorder %s1916_s12, %s1482_s13 }
  0x8a   : > { %v1349_v10 = vld [vmem:[#allocation5 + $0x28] sm:$0xff]   ;;  %1181 = vmatprep.subr.bf16.mxu1 %v1352_v8  ;;  %v1355_v13 = vld [vmem:[#allocation7 + $0x18] sm:$0xff]   ;;  %v1356_v15 = vld [vmem:[#allocation7 + $0x20] sm:$0xff]  }
  0x8b   : > { %1165 = vmatprep.mubr.bf16.mxu0 %v360_v6  ;;  %1182 = vmatpush3.bf16.msra.mxu1 %v1352_v8  ;;  %v1351_v14 = vld [vmem:[#allocation5 + $0x38] sm:$0xff]   ;;  %v346_v16 = vld [vmem:[%s1817_s20 + $0x10] sm:$0xff]  ;;  %v348_v18 = vld [vmem:[%s1817_s20 + $0x20] sm:$0xff]  ;;  %p1484_p3 = pnand %p1483_p10, %p1763_p5 }
  0x8c   : > { %1152 = vmatpush3.bf16.msra.mxu0 %v1345_v1  ;;  %1183 = vmatprep.subr.bf16.mxu1 %v1353_v9  ;;  %v347_v17 = vld [vmem:[%s1817_s20 + $0x18] sm:$0xff]  ;;  %v349_v19 = vld [vmem:[%s1817_s20 + $0x28] sm:$0xff]  ;;  %v350_v23 = vld [vmem:[%s1817_s20 + $0x30] sm:$0xff] }
  0x8d   : > { %1153 = vmatprep.subr.bf16.mxu0 %v1346_v2  ;;  %v361_v20 = vpack.c.bf16 %v347_v17, %v346_v16  ;;  %v1357_v21 = vld [vmem:[#allocation7 + $0x28] sm:$0xff]   ;;  %v362_v22 = vpack.c.bf16 %v349_v19, %v348_v18  ;;  %v351_v24 = vld [vmem:[%s1817_s20 + $0x38] sm:$0xff]  ;;  %v352_v25 = vld [vmem:[%s1817_s20 + $0x40] sm:$0xff]  ;;  %p1485_p7 = pneg %p1484_p3 }
  0x8e   : > { %v353_v26 = vld [vmem:[%s1817_s20 + $0x48] sm:$0xff]  ;;  %v363_v27 = vpack.c.bf16 %v351_v24, %v350_v23  ;;  %v354_v29 = vld [vmem:[%s1817_s20 + $0x50] sm:$0xff]  ;;  %v355_v30 = vld [vmem:[%s1817_s20 + $0x58] sm:$0xff] }
  0x8f   : > { %1184 = vmatpush3.bf16.msra.mxu1 %v1353_v9  ;;  %v364_v28 = vpack.c.bf16 %v353_v26, %v352_v25  ;;  %v356_v31 = vld [vmem:[%s1817_s20 + $0x60] sm:$0xff]  ;;  %v357_v32 = vld [vmem:[%s1817_s20 + $0x68] sm:$0xff]  ;;  %v365_v33 = vpack.c.bf16 %v355_v30, %v354_v29  ;;  %v358_v35 = vld [vmem:[%s1817_s20 + $0x70] sm:$0xff] }
  0x90   : > { %1154 = vmatpush3.bf16.msra.mxu0 %v1346_v2  ;;  %1185 = vmatprep.subr.bf16.mxu1 %v1354_v11  ;;  %v366_v34 = vpack.c.bf16 %v357_v32, %v356_v31  ;;  %v359_v36 = vld [vmem:[%s1817_s20 + $0x78] sm:$0xff]  ;;  %v1358_v38 = vld [vmem:[#allocation7 + $0x30] sm:$0xff]   ;;  %v1360_v40 = vld [vmem:[#allocation8] sm:$0xff]   ;;  %s1566_s20 = smov [#allocation10]  }
  0x91   : > { %1155 = vmatprep.subr.bf16.mxu0 %v1347_v3  ;;  %v367_v37 = vpack.c.bf16 %v359_v36, %v358_v35  ;;  %v1359_v39 = vld [vmem:[#allocation7 + $0x38] sm:$0xff]   ;;  %v1361_v41 = vld [vmem:[#allocation8 + $0x8] sm:$0xff]   ;;  %v1362_v42 = vld [vmem:[#allocation8 + $0x10] sm:$0xff]   ;;  %s1486_s30 = sshll.u32 %s1566_s20, 4  ;;  %s1487_s30 = int_to_ptr.vmem [resolvable:$false] %s1486_s30 }
  0x92   : > { %v1847_v43 = vld [vmem:[#allocation8 + $0x18] sm:$0xff]   ;;  %v1850_v44 = vld [vmem:[#allocation8 + $0x20] sm:$0xff]   ;;  %v1854_v45 = vld [vmem:[#allocation8 + $0x28] sm:$0xff]   ;;  %s1488_s9 = scalar_lea.vmem %s1487_s30, 4096  ;;  %p1489_p12 = scmp.lt.s32.totalorder %s1916_s12, %s1487_s30 }
  0x93   : > { %1186 = vmatpush3.bf16.msra.mxu1 %v1354_v11  ;;  %v1862_v46 = vld [vmem:[%s1965_s2] ss:$0 sm:$0xff]  ;;  %p1490_p1 = scmp.lt.s32.totalorder %s1488_s9, %s1482_s13 }
  0x94   : > { %1156 = vmatpush3.bf16.msra.mxu0 %v1347_v3  ;;  %1187 = vmatprep.subr.bf16.mxu1 %v1355_v13 }
  0x95   : > { %1157 = vmatprep.subr.bf16.mxu0 %v1348_v7  ;;  %p1491_p2 = por %p1490_p1, %p1489_p12 }
  0x97   : > { %1188 = vmatpush3.bf16.msra.mxu1 %v1355_v13  ;;  %p1492_p4 = pnand %p1491_p2, %p1485_p7 }
  0x98   : > { %1158 = vmatpush3.bf16.msra.mxu0 %v1348_v7  ;;  %1189 = vmatprep.subr.bf16.mxu1 %v1356_v15 }
  0x99   : > { %1159 = vmatprep.subr.bf16.mxu0 %v1349_v10 }
  0x9b   : > { %1190 = vmatpush3.bf16.msra.mxu1 %v1356_v15 }
  0x9c   : > { %1160 = vmatpush3.bf16.msra.mxu0 %v1349_v10  ;;  %1191 = vmatprep.subr.bf16.mxu1 %v1357_v21 }
  0x9d   : > { %1161 = vmatprep.subr.bf16.mxu0 %v1350_v12 }
  0x9f   : > { %1192 = vmatpush3.bf16.msra.mxu1 %v1357_v21 }
  0xa0   : > { %1162 = vmatpush3.bf16.msra.mxu0 %v1350_v12  ;;  %1193 = vmatprep.subr.bf16.mxu1 %v1358_v38 }
  0xa1   : > { %1163 = vmatprep.subr.bf16.mxu0 %v1351_v14 }
  0xa3   : > { %1194 = vmatpush3.bf16.msra.mxu1 %v1358_v38 }
  0xa4   : > { %1164 = vmatpush3.bf16.msra.mxu0 %v1351_v14  ;;  %1195 = vmatprep.subr.bf16.mxu1 %v1359_v39 }
  0xa5   : > { %1213 = vmatprep.subr.bf16.mxu0 %v1360_v40 }
  0xa7   : > { %1166 = vmatmul.mubr.bf16.vlgmr.msra.gmra.mrb[0].mxu0 %v361_v20  ;;  %1196 = vmatpush3.bf16.msra.mxu1 %v1359_v39  ;;  %v1366_v39 = vld [vmem:[#allocation8 + $0x30] sm:$0xff]  }
  0xa8   : > { %1169 = vmatprep.mubr.bf16.mxu0 %v362_v22  ;;  %1245 = vmatprep.subr.bf16.mxu1 %v1360_v40 }
  0xa9   : > { %1214 = vmatpush3.bf16.msra.mxu0 %v1360_v40 }
  0xaa   : > { %1215 = vmatprep.subr.bf16.mxu0 %v1361_v41 }
  0xad   : > { %1216 = vmatpush3.bf16.msra.mxu0 %v1361_v41 }
  0xae   : > { %1217 = vmatprep.subr.bf16.mxu0 %v1362_v42 }
  0xaf   : > { %1170 = vmatmul.mubr.bf16.gmra.mrb[4].mxu0 %v363_v27 }
  0xb0   : > { %1173 = vmatprep.mubr.bf16.mxu0 %v364_v28 }
  0xb1   : > { %1218 = vmatpush3.bf16.msra.mxu0 %v1362_v42 }
  0xb2   : > { %1219 = vmatprep.subr.bf16.mxu0 %v1847_v43 }
  0xb5   : > { %1220 = vmatpush3.bf16.msra.mxu0 %v1847_v43 }
  0xb6   : > { %1221 = vmatprep.subr.bf16.mxu0 %v1850_v44 }
  0xb7   : > { %1174 = vmatmul.mubr.bf16.gmra.mrb[8].mxu0 %v365_v33 }
  0xb8   : > { %1177 = vmatprep.mubr.bf16.mxu0 %v366_v34 }
  0xb9   : > { %1222 = vmatpush3.bf16.msra.mxu0 %v1850_v44 }
  0xba   : > { %1223 = vmatprep.subr.bf16.mxu0 %v1854_v45 }
  0xbd   : > { %1224 = vmatpush3.bf16.msra.mxu0 %v1854_v45 }
  0xbe   : > { %1225 = vmatprep.subr.bf16.mxu0 %v1366_v39 }
  0xbf   : > { %1178 = vmatmul.mubr.bf16.gmra.mrb[12].mxu0 %v367_v37 }
  0xc1   : > { %1226 = vmatpush3.bf16.msra.mxu0 %v1366_v39 }
 0x17a   : > { %v1167_v47 = vpop.f32.mrb[0].mxu0 }
 0x17b   : > { %v482_v48 = vadd.f32 %v1167_v47, %v1862_v46  ;;  %v473_v49 = vpop.f32.mrb[1].mxu0 }
 0x17c   : > { %v474_v50 = vadd.f32 %v1862_v46, %v473_v49  ;;  %v1168_v51 = vpop.f32.mrb[2].mxu0 }
 0x17d   : > { %v485_v52 = vadd.f32 %v1168_v51, %v1862_v46  ;;  %v476_v53 = vpop.f32.mrb[3].mxu0  ;;  %v538_v55 = vmax.f32 %v482_v48, 0.0 }
 0x17e   : > { %v477_v54 = vadd.f32 %v1862_v46, %v476_v53  ;;  %v536_v57 = vmax.f32 %v474_v50, 0.0 }
 0x17f   : > { %v539_v56 = vmax.f32 %v485_v52, 0.0 }
 0x180   : > { %v537_v58 = vmax.f32 %v477_v54, 0.0 }
 0x181   : > { %v553_v59 = vpack.c.bf16 %v539_v56, %v538_v55 }
 0x182   : > { %v1171_v60 = vpop.f32.mrb[4].mxu0  ;;  %v552_v61 = vpack.c.bf16 %v537_v58, %v536_v57 }
 0x183   : > { %v498_v62 = vadd.f32 %v1171_v60, %v1862_v46  ;;  %v489_v63 = vpop.f32.mrb[5].mxu0 }
 0x184   : > { %v490_v0 = vadd.f32 %v1862_v46, %v489_v63  ;;  %v1172_v1 = vpop.f32.mrb[6].mxu0  ;;  %1197 = vmatprep.mubr.bf16.mxu1 %v552_v61 }
 0x185   : > { %v501_v2 = vadd.f32 %v1172_v1, %v1862_v46  ;;  %v492_v3 = vpop.f32.mrb[7].mxu0  ;;  %1198 = vmatmul.mubr.bf16.vlgmr.msra.gmra.mrb[0].mxu1 %v553_v59  ;;  %v542_v5 = vmax.f32 %v498_v62, 0.0 }
 0x186   : > { %v493_v4 = vadd.f32 %v1862_v46, %v492_v3  ;;  %1253 = vmatpush3.bf16.msra.mxu1 %v1360_v40  ;;  %v540_v7 = vmax.f32 %v490_v0, 0.0  ;;  %v1367_v40 = vld [vmem:[#allocation8 + $0x38] sm:$0xff]  }
 0x187   : > { %v543_v6 = vmax.f32 %v501_v2, 0.0  ;;  %1246 = vmatprep.subr.bf16.mxu1 %v1361_v41  ;;  %1227 = vmatprep.subr.bf16.mxu0 %v1367_v40 }
 0x188   : > { %v541_v8 = vmax.f32 %v493_v4, 0.0  ;;  %1228 = vmatpush3.bf16.msra.mxu0 %v1367_v40 }
 0x189   : > { %v555_v9 = vpack.c.bf16 %v543_v6, %v542_v5 }
 0x18a   : > { %v554_v10 = vpack.c.bf16 %v541_v8, %v540_v7  ;;  %v1175_v11 = vpop.f32.mrb[8].mxu0  ;;  %1254 = vmatpush3.bf16.msra.mxu1 %v1361_v41  ;;  %v1076_v41 = vld [vmem:[%s1967_s4] ss:$0 sm:$0xff] }
 0x18b   : > { %v514_v12 = vadd.f32 %v1175_v11, %v1862_v46  ;;  %v505_v13 = vpop.f32.mrb[9].mxu0  ;;  %1247 = vmatprep.subr.bf16.mxu1 %v1362_v42 }
 0x18c   : > { %v506_v14 = vadd.f32 %v1862_v46, %v505_v13  ;;  %v1176_v15 = vpop.f32.mrb[10].mxu0  ;;  %1201 = vmatprep.mubr.bf16.mxu1 %v554_v10 }
 0x18d   : > { %v517_v16 = vadd.f32 %v1176_v15, %v1862_v46  ;;  %v508_v17 = vpop.f32.mrb[11].mxu0  ;;  %1202 = vmatmul.mubr.bf16.gmra.mrb[4].mxu1 %v555_v9  ;;  %v546_v19 = vmax.f32 %v514_v12, 0.0 }
 0x18e   : > { %v509_v18 = vadd.f32 %v1862_v46, %v508_v17  ;;  %1255 = vmatpush3.bf16.msra.mxu1 %v1362_v42  ;;  %v544_v21 = vmax.f32 %v506_v14, 0.0 }
 0x18f   : > { %v547_v20 = vmax.f32 %v517_v16, 0.0  ;;  %1248 = vmatprep.subr.bf16.mxu1 %v1847_v43 }
 0x190   : > { %v545_v22 = vmax.f32 %v509_v18, 0.0 }
 0x191   : > { %v557_v23 = vpack.c.bf16 %v547_v20, %v546_v19 }
 0x192   : > { %v556_v24 = vpack.c.bf16 %v545_v22, %v544_v21  ;;  %v1179_v25 = vpop.f32.mrb[12].mxu0  ;;  %1256 = vmatpush3.bf16.msra.mxu1 %v1847_v43 }
 0x193   : > { %v530_v26 = vadd.f32 %v1179_v25, %v1862_v46  ;;  %v521_v27 = vpop.f32.mrb[13].mxu0  ;;  %1249 = vmatprep.subr.bf16.mxu1 %v1850_v44 }
 0x194   : > { %v522_v28 = vadd.f32 %v1862_v46, %v521_v27  ;;  %v1180_v29 = vpop.f32.mrb[14].mxu0  ;;  %1205 = vmatprep.mubr.bf16.mxu1 %v556_v24 }
 0x195   : > { %v533_v30 = vadd.f32 %v1180_v29, %v1862_v46  ;;  %v524_v31 = vpop.f32.mrb[15].mxu0  ;;  %1206 = vmatmul.mubr.bf16.gmra.mrb[8].mxu1 %v557_v23  ;;  %v550_v33 = vmax.f32 %v530_v26, 0.0 }
 0x196   : > { %v525_v32 = vadd.f32 %v1862_v46, %v524_v31  ;;  %1257 = vmatpush3.bf16.msra.mxu1 %v1850_v44  ;;  %v548_v35 = vmax.f32 %v522_v28, 0.0 }
 0x197   : > { %v551_v34 = vmax.f32 %v533_v30, 0.0  ;;  %1250 = vmatprep.subr.bf16.mxu1 %v1854_v45 }
 0x198   : > { %v549_v36 = vmax.f32 %v525_v32, 0.0 }
 0x199   : > { %v559_v37 = vpack.c.bf16 %v551_v34, %v550_v33  ;;  %v1085_v34 = vld [vmem:[%s1969_s6] ss:$0 sm:$0xff] }
 0x19a   : > { %v558_v38 = vpack.c.bf16 %v549_v36, %v548_v35  ;;  %1258 = vmatpush3.bf16.msra.mxu1 %v1854_v45 }
 0x19b   : > { %1251 = vmatprep.subr.bf16.mxu1 %v1366_v39 }
 0x19c   : > { %1209 = vmatprep.mubr.bf16.mxu1 %v558_v38 }
 0x19d   : > { %1210 = vmatmul.mubr.bf16.gmra.mrb[12].mxu1 %v559_v37 }
 0x19e   : > { %1259 = vmatpush3.bf16.msra.mxu1 %v1366_v39 }
 0x19f   : > { %1252 = vmatprep.subr.bf16.mxu1 %v1367_v40 }
 0x1a2   : > { %1260 = vmatpush3.bf16.msra.mxu1 %v1367_v40 }
 0x258   : > { %v1199_v42 = vpop.f32.mrb[0].mxu1 }
 0x259   : > { %v674_v43 = vadd.f32 %v1199_v42, %v1076_v41  ;;  %v665_v44 = vpop.f32.mrb[1].mxu1 }
 0x25a   : > { %v666_v45 = vadd.f32 %v1076_v41, %v665_v44  ;;  %v1200_v46 = vpop.f32.mrb[2].mxu1 }
 0x25b   : > { %v677_v47 = vadd.f32 %v1200_v46, %v1076_v41  ;;  %v668_v48 = vpop.f32.mrb[3].mxu1  ;;  %v730_v50 = vmax.f32 %v674_v43, 0.0 }
 0x25c   : > { %v669_v49 = vadd.f32 %v1076_v41, %v668_v48  ;;  %v728_v52 = vmax.f32 %v666_v45, 0.0 }
 0x25d   : > { %v731_v51 = vmax.f32 %v677_v47, 0.0 }
 0x25e   : > { %v729_v53 = vmax.f32 %v669_v49, 0.0 }
 0x25f   : > { %v745_v54 = vpack.c.bf16 %v731_v51, %v730_v50 }
 0x260   : > { %v744_v55 = vpack.c.bf16 %v729_v53, %v728_v52  ;;  %v1203_v56 = vpop.f32.mrb[4].mxu1 }
 0x261   : > { %v690_v57 = vadd.f32 %v1203_v56, %v1076_v41  ;;  %v681_v58 = vpop.f32.mrb[5].mxu1 }
 0x262   : > { %v682_v59 = vadd.f32 %v1076_v41, %v681_v58  ;;  %v1204_v60 = vpop.f32.mrb[6].mxu1  ;;  %1229 = vmatprep.mubr.bf16.mxu0 %v744_v55 }
 0x263   : > { %v693_v61 = vadd.f32 %v1204_v60, %v1076_v41  ;;  %v684_v62 = vpop.f32.mrb[7].mxu1  ;;  %1230 = vmatmul.mubr.bf16.vlgmr.msra.gmra.mrb[16].mxu0 %v745_v54  ;;  %v734_v0 = vmax.f32 %v690_v57, 0.0 }
 0x264   : > { %v685_v63 = vadd.f32 %v1076_v41, %v684_v62  ;;  %v732_v2 = vmax.f32 %v682_v59, 0.0 }
 0x265   : > { %v735_v1 = vmax.f32 %v693_v61, 0.0 }
 0x266   : > { %v733_v3 = vmax.f32 %v685_v63, 0.0 }
 0x267   : > { %v747_v4 = vpack.c.bf16 %v735_v1, %v734_v0 }
 0x268   : > { %v746_v5 = vpack.c.bf16 %v733_v3, %v732_v2  ;;  %v1207_v6 = vpop.f32.mrb[8].mxu1 }
 0x269   : > { %v706_v7 = vadd.f32 %v1207_v6, %v1076_v41  ;;  %v697_v8 = vpop.f32.mrb[9].mxu1 }
 0x26a   : > { %v698_v9 = vadd.f32 %v1076_v41, %v697_v8  ;;  %v1208_v10 = vpop.f32.mrb[10].mxu1  ;;  %1233 = vmatprep.mubr.bf16.mxu0 %v746_v5 }
 0x26b   : > { %v709_v11 = vadd.f32 %v1208_v10, %v1076_v41  ;;  %v700_v12 = vpop.f32.mrb[11].mxu1  ;;  %1234 = vmatmul.mubr.bf16.gmra.mrb[20].mxu0 %v747_v4  ;;  %v738_v14 = vmax.f32 %v706_v7, 0.0 }
 0x26c   : > { %v701_v13 = vadd.f32 %v1076_v41, %v700_v12  ;;  %v736_v16 = vmax.f32 %v698_v9, 0.0 }
 0x26d   : > { %v739_v15 = vmax.f32 %v709_v11, 0.0 }
 0x26e   : > { %v737_v17 = vmax.f32 %v701_v13, 0.0 }
 0x26f   : > { %v749_v18 = vpack.c.bf16 %v739_v15, %v738_v14 }
 0x270   : > { %v748_v19 = vpack.c.bf16 %v737_v17, %v736_v16  ;;  %v1211_v20 = vpop.f32.mrb[12].mxu1 }
 0x271   : > { %v722_v21 = vadd.f32 %v1211_v20, %v1076_v41  ;;  %v713_v22 = vpop.f32.mrb[13].mxu1 }
 0x272   : > { %v714_v23 = vadd.f32 %v1076_v41, %v713_v22  ;;  %v1212_v24 = vpop.f32.mrb[14].mxu1  ;;  %1237 = vmatprep.mubr.bf16.mxu1 %v748_v19 }
 0x273   : > { %v725_v25 = vadd.f32 %v1212_v24, %v1076_v41  ;;  %v716_v26 = vpop.f32.mrb[15].mxu1  ;;  %1238 = vmatmul.mubr.bf16.vlgmr.msra.gmra.mrb[16].mxu1 %v749_v18  ;;  %v742_v28 = vmax.f32 %v722_v21, 0.0 }
 0x274   : > { %v717_v27 = vadd.f32 %v1076_v41, %v716_v26  ;;  %v740_v30 = vmax.f32 %v714_v23, 0.0 }
 0x275   : > { %v743_v29 = vmax.f32 %v725_v25, 0.0 }
 0x276   : > { %v741_v31 = vmax.f32 %v717_v27, 0.0 }
 0x277   : > { %v751_v32 = vpack.c.bf16 %v743_v29, %v742_v28 }
 0x278   : > { %v750_v33 = vpack.c.bf16 %v741_v31, %v740_v30 }
 0x27a   : > { %1241 = vmatprep.mubr.bf16.mxu1 %v750_v33 }
 0x27b   : > { %1242 = vmatmul.mubr.bf16.gmra.mrb[20].mxu1 %v751_v32 }
 0x336   : > { %v1231_v35 = vpop.f32.mrb[16].mxu0 }
 0x337   : > { %v866_v36 = vadd.f32 %v1231_v35, %v1085_v34  ;;  %v857_v37 = vpop.f32.mrb[17].mxu0 }
 0x338   : > { %v858_v38 = vadd.f32 %v1085_v34, %v857_v37  ;;  %v1232_v39 = vpop.f32.mrb[18].mxu0 }
 0x339   : > { %922 = vst [vmem:[%s1894_s15 + $0x10] sm:$0xff] %v866_v36  ;;  %v869_v40 = vadd.f32 %v1232_v39, %v1085_v34  ;;  %v860_v41 = vpop.f32.mrb[19].mxu0 }
 0x33a   : > { %920 = vst [vmem:[%s1894_s15] sm:$0xff] %v858_v38  ;;  %v861_v42 = vadd.f32 %v1085_v34, %v860_v41 }
 0x33b   : > { %923 = vst [vmem:[%s1894_s15 + $0x18] sm:$0xff] %v869_v40 }
 0x33c   : > { %921 = vst [vmem:[%s1894_s15 + $0x8] sm:$0xff] %v861_v42 }
 0x33e   : > { %v1235_v43 = vpop.f32.mrb[20].mxu0 }
 0x33f   : > { %v882_v44 = vadd.f32 %v1235_v43, %v1085_v34  ;;  %v873_v45 = vpop.f32.mrb[21].mxu0 }
 0x340   : > { %v874_v46 = vadd.f32 %v1085_v34, %v873_v45  ;;  %v1236_v47 = vpop.f32.mrb[22].mxu0 }
 0x341   : > { %926 = vst [vmem:[%s1894_s15 + $0x30] sm:$0xff] %v882_v44  ;;  %v885_v48 = vadd.f32 %v1236_v47, %v1085_v34  ;;  %v876_v49 = vpop.f32.mrb[23].mxu0 }
 0x342   : > { %924 = vst [vmem:[%s1894_s15 + $0x20] sm:$0xff] %v874_v46  ;;  %v877_v50 = vadd.f32 %v1085_v34, %v876_v49 }
 0x343   : > { %927 = vst [vmem:[%s1894_s15 + $0x38] sm:$0xff] %v885_v48 }
 0x344   : > { %925 = vst [vmem:[%s1894_s15 + $0x28] sm:$0xff] %v877_v50 }
 0x346   : > { %v1239_v51 = vpop.f32.mrb[16].mxu1 }
 0x347   : > { %v898_v52 = vadd.f32 %v1239_v51, %v1085_v34  ;;  %v889_v53 = vpop.f32.mrb[17].mxu1 }
 0x348   : > { %v890_v54 = vadd.f32 %v1085_v34, %v889_v53  ;;  %v1240_v55 = vpop.f32.mrb[18].mxu1 }
 0x349   : > { %930 = vst [vmem:[%s1894_s15 + $0x50] sm:$0xff] %v898_v52  ;;  %v901_v56 = vadd.f32 %v1240_v55, %v1085_v34  ;;  %v892_v57 = vpop.f32.mrb[19].mxu1 }
 0x34a   : > { %928 = vst [vmem:[%s1894_s15 + $0x40] sm:$0xff] %v890_v54  ;;  %v893_v58 = vadd.f32 %v1085_v34, %v892_v57 }
 0x34b   : > { %931 = vst [vmem:[%s1894_s15 + $0x58] sm:$0xff] %v901_v56 }
 0x34c   : > { %929 = vst [vmem:[%s1894_s15 + $0x48] sm:$0xff] %v893_v58 }
 0x34e   : > { %v1243_v59 = vpop.f32.mrb[20].mxu1 }
 0x34f   : > { %v914_v60 = vadd.f32 %v1243_v59, %v1085_v34  ;;  %v905_v61 = vpop.f32.mrb[21].mxu1 }
 0x350   : > { %v906_v62 = vadd.f32 %v1085_v34, %v905_v61  ;;  %v1244_v63 = vpop.f32.mrb[22].mxu1 }
 0x351   : > { %934 = vst [vmem:[%s1894_s15 + $0x70] sm:$0xff] %v914_v60  ;;  %v917_v0 = vadd.f32 %v1244_v63, %v1085_v34  ;;  %v908_v1 = vpop.f32.mrb[23].mxu1 }
 0x352   : > { %932 = vst [vmem:[%s1894_s15 + $0x60] sm:$0xff] %v906_v62  ;;  %v909_v2 = vadd.f32 %v1085_v34, %v908_v1 }
 0x353   : > { %935 = vst [vmem:[%s1894_s15 + $0x78] sm:$0xff] %v917_v0 }
 0x354   : > { %933 = vst [vmem:[%s1894_s15 + $0x68] sm:$0xff] %v909_v2 }
 0x355   : > { %1495 = shalt.err (!%p1492_p4)
}
 0x356   : > { %s1496_s23 = scalar_lea.hbm %s1914_s16, 2048  ;;  %s1500_s14 = scalar_lea.hbm %s1970_s7, 4096 }
 0x357   : > { %p1497_p9 = scmp.ne.s32.totalorder %s1914_s16, %s1496_s23  ;;  %p1501_p8 = scmp.lt.u32.totalorder %s1914_s16, %s1970_s7 }
 0x358   : > { %p1502_p13 = scmp.lt.u32.totalorder %s1500_s14, %s1496_s23  ;;  %p1504_p10 = scmp.lt.u32.totalorder %s1496_s23, %s1914_s16 }
 0x359   : > { %p1498_p0 = pnand %p1497_p9, %p1763_p5 }
 0x35a   : > { %p1503_p6 = por %p1502_p13, %p1501_p8 }
 0x35b   : > { %p1499_p11 = pneg %p1498_p0 }
 0x35c   : > { %p1505_p3 = por %p1504_p10, %p1503_p6 }
 0x35e   : > { %p1506_p7 = pnand %p1505_p3, %p1499_p11 }
 0x360   : > { %1509 = shalt.err (!%p1506_p7)
}
 0x361   : > { %s1567_s8 = smov 128   ;;  %s1568_s17 = smov 8  }
 0x362   : > { %1275 = dma.vmem_to_hbm [thread:$0]  (%p1763_p5), %s1916_s12, 2048, %s1914_s16, %s937_s28, %s1567_s8, %s1567_s8, %s1568_s17  }
 0x363 PF: > { %s1990_s13 = sld [smem:[#allocation15_spill]]  ;;  %s965_s20 = sand.u32 1, %s1544_s24  }
 0x364   : > { %p1992_p1 = scmp.ge.s32.totalorder %s1556_s27, 2  ;;  %s966_s30 = scalar_lea.sflag [#allocation4], %s965_s20 }
 0x369   : > { %p1991_p12 = scmp.ne.s32.totalorder %s1990_s13, 0 }
 0x36b   : > { %p1292_p2 = pnand %p1992_p1, %p1991_p12 }
 0x36d   : > { %1539 = dma.done.wait (!%p1292_p2), %s966_s30, 2048  }
 0x36e   : > { %1541 = vsyncadd (!%p1292_p2), %s966_s30, 4294965248  ;;  %p22_p4 = scmp.ge.s32.totalorder %s1749_s22, 4   ;;  %s1993_s24 = smov %s1548_s25 }
 0x36f   : > { %s1994_s25 = smov %s1552_s26  ;;  %s1995_s26 = smov %s1759_s18 }
 0x370   : > { %s1996_s27 = smov %s1749_s22  ;;  %24 = sbr.rel (!%p22_p4) target bundleno = 7 (0x7), region = 105 }
 0x377   :  { %971 = vsyncpa [#allocation3], 1 }
 0x378   :  { %973 = vsyncpa [#allocation3 + $0x1], 1 }
 0x379   :  { %974 = vsyncpa [#allocation6], 1 }
 0x37a   :  { %975 = vsyncpa [#allocation9], 1 }
 0x37b   :  { %976 = vsyncpa [#allocation4], 1 }
 0x37c   :  { %978 = vsyncpa [#allocation4 + $0x1], 1 }

</bundles_post_ra>
